<compile_context>
chip_gen: v7x
topology: tpu7x:2x2x1
jax: 0.10.0
libtpu: 0.0.40
codegen_flags: <defaults>
</compile_context>

<pallas_src>
import functools

import jax
import jax.numpy as jnp
import numpy as np
from jax.experimental import pallas as pl
from jax.experimental.pallas import tpu as pltpu

_VMEM_LIMIT = 48 * 1024 * 1024  # explicit scoped-VMEM limit (safe on v5e/v6e/v7x)


# ---------------------------------------------------------------------------
# Kernel 1: pointwise (1x1) conv(s) as row-tiled matmuls.
#   x2d: (N, Cin); each output o = x2d @ w + b, computed tile-by-tile over rows.
# ---------------------------------------------------------------------------
def _pointwise_kernel(n_out, *refs):
    x_ref = refs[0]
    w_refs = refs[1:1 + n_out]
    b_refs = refs[1 + n_out:1 + 2 * n_out]
    o_refs = refs[1 + 2 * n_out:]
    x = x_ref[...].astype(jnp.bfloat16)          # bf16 MXU operands
    for w_ref, b_ref, o_ref in zip(w_refs, b_refs, o_refs):
        acc = jnp.dot(x, w_ref[...].astype(jnp.bfloat16),
                      preferred_element_type=jnp.float32)
        o_ref[...] = (acc + b_ref[...].astype(jnp.float32)).astype(o_ref.dtype)


def pointwise_conv(x2d, weights, biases, row_tile=1024):
    """weights: list of (Cin, Cout_i); biases: list of (1, Cout_i).  Returns tuple."""
    N, cin = x2d.shape
    n_out = len(weights)
    tn = min(row_tile, N)
    grid = (pl.cdiv(N, tn),)
    in_specs = [pl.BlockSpec((tn, cin), lambda i: (i, 0))]
    in_specs += [pl.BlockSpec(w.shape, lambda i: (0, 0)) for w in weights]
    in_specs += [pl.BlockSpec(b.shape, lambda i: (0, 0)) for b in biases]
    out_specs = tuple(pl.BlockSpec((tn, w.shape[1]), lambda i: (i, 0))
                      for w in weights)
    out_shape = tuple(jax.ShapeDtypeStruct((N, w.shape[1]), x2d.dtype)
                      for w in weights)
    return pl.pallas_call(
        functools.partial(_pointwise_kernel, n_out),
        grid=grid,
        in_specs=in_specs,
        out_specs=out_specs,
        out_shape=out_shape,
        compiler_params=pltpu.CompilerParams(
            dimension_semantics=("parallel",),
            vmem_limit_bytes=_VMEM_LIMIT),
    )(x2d, *weights, *biases)


# ---------------------------------------------------------------------------
# Kernel 2: depthwise 3x3 conv (padding=1), channels-last.
#   Halo handled in-kernel via a zero-initialized VMEM scratch.  The interior
#   is stored at a sublane-aligned offset (_LEFT = 8); only 1 halo column is
#   logically needed, the rest stays zero.
# ---------------------------------------------------------------------------
_LEFT = 8  # sublane-aligned left halo


def _dwconv_kernel(x_ref, w_ref, b_ref, o_ref, xp_ref):
    # x_ref/o_ref: (1, H, W, CT); w_ref: (9, 1, 1, CT); b_ref: (1, 1, CT)
    # xp_ref: (H+2, W+_LEFT+1, CT) f32 scratch.
    _, H, W, _ = o_ref.shape
    xp_ref[...] = jnp.zeros_like(xp_ref)
    xp_ref[1:H + 1, _LEFT:_LEFT + W, :] = x_ref[0].astype(jnp.float32)
    w = w_ref[...].astype(jnp.float32)           # (9, 1, 1, CT)
    acc = jnp.zeros(o_ref.shape[1:], jnp.float32)
    for dh in range(3):
        for dw in range(3):
            c0 = _LEFT - 1 + dw
            acc = acc + xp_ref[dh:dh + H, c0:c0 + W, :] * w[3 * dh + dw]
    o_ref[0] = (acc + b_ref[...].astype(jnp.float32)).astype(o_ref.dtype)


def dwconv3x3(x, w9, b, c_tile=None):
    # x: (B, H, W, C) channels-last; w9: (9, 1, 1, C); b: (1, 1, C)
    B, H, W, C = x.shape
    if c_tile is None:
        c_tile = 128 if C % 128 == 0 else C      # lane dim: 128-multiple or full
    grid = (B, C // c_tile)
    return pl.pallas_call(
        _dwconv_kernel,
        out_shape=jax.ShapeDtypeStruct((B, H, W, C), x.dtype),
        grid=grid,
        in_specs=[
            pl.BlockSpec((1, H, W, c_tile), lambda bi, ci: (bi, 0, 0, ci)),
            pl.BlockSpec((9, 1, 1, c_tile), lambda bi, ci: (0, 0, 0, ci)),
            pl.BlockSpec((1, 1, c_tile), lambda bi, ci: (0, 0, ci)),
        ],
        out_specs=pl.BlockSpec((1, H, W, c_tile), lambda bi, ci: (bi, 0, 0, ci)),
        scratch_shapes=[pltpu.VMEM((H + 2, W + _LEFT + 1, c_tile), jnp.float32)],
        compiler_params=pltpu.CompilerParams(
            dimension_semantics=("parallel", "parallel"),
            vmem_limit_bytes=_VMEM_LIMIT),
    )(x, w9, b)


# ---------------------------------------------------------------------------
# Kernel 3: per-head channel attention, channels-last, two-pass L-streaming.
#   q, k, v: (B, L, C).  Pass 1 (grid steps 0..nL-1): accumulate the full CxC
#   Gram G = q^T k and the per-channel sums of squares; at the last tile fold
#   the L2 norms + temperature into G, apply a block-diagonal head mask and
#   softmax, storing P (CxC) in scratch.  Pass 2 (steps nL..2nL-1): stream v
#   tiles and emit out_tile = v_tile @ P^T.
# ---------------------------------------------------------------------------
def _attn_kernel(q_ref, k_ref, v_ref, t_ref, o_ref,
                 g_ref, nq_ref, nk_ref, p_ref, *, c_head):
    s = pl.program_id(1)
    n_l = pl.num_programs(1) // 2
    C = o_ref.shape[-1]

    @pl.when(s == 0)
    def _():
        g_ref[...] = jnp.zeros_like(g_ref)
        nq_ref[...] = jnp.zeros_like(nq_ref)
        nk_ref[...] = jnp.zeros_like(nk_ref)

    @pl.when(s < n_l)                       # pass 1: accumulate Gram + norms
    def _():
        xq = q_ref[0].astype(jnp.float32)   # (Lt, C)
        xk = k_ref[0].astype(jnp.float32)
        g_ref[...] += jnp.dot(xq.T.astype(jnp.bfloat16),
                              xk.astype(jnp.bfloat16),
                              preferred_element_type=jnp.float32)
        nq_ref[...] += jnp.sum(xq * xq, axis=0, keepdims=True)
        nk_ref[...] += jnp.sum(xk * xk, axis=0, keepdims=True)

    @pl.when(s == n_l - 1)                  # finalize: masked, scaled softmax
    def _():
        eps = 1e-12                          # matches F.normalize default
        rq = 1.0 / jnp.maximum(jnp.sqrt(nq_ref[...]), eps)   # (1, C)
        rk = 1.0 / jnp.maximum(jnp.sqrt(nk_ref[...]), eps)   # (1, C)
        # logits[i, j] = G[i, j] * rq[i] * t[i] * rk[j]
        logits = (g_ref[...].T * (rq * t_ref[...])).T * rk
        row_h = jax.lax.broadcasted_iota(jnp.int32, (C, C), 0) // c_head
        col_h = jax.lax.broadcasted_iota(jnp.int32, (C, C), 1) // c_head
        logits = jnp.where(row_h == col_h, logits, -1e30)     # block-diag heads
        m = jnp.max(logits, axis=-1, keepdims=True)
        e = jnp.exp(logits - m)
        p_ref[...] = e * pl.reciprocal(jnp.sum(e, axis=-1, keepdims=True),
                                       approx=True)

    @pl.when(s >= n_l)                      # pass 2: out_tile = v_tile @ P^T
    def _():
        xv = v_ref[0].astype(jnp.bfloat16)
        out = jax.lax.dot_general(
            xv, p_ref[...].astype(jnp.bfloat16),
            (((1,), (1,)), ((), ())), preferred_element_type=jnp.float32)
        o_ref[0] = out.astype(o_ref.dtype)


def _pick_l_tile(L, cap=2048):
    t = 1
    while t * 2 <= cap and L % (t * 2) == 0:
        t *= 2
    return t if t >= 8 else L


def channel_attention(q, k, v, t_row, num_heads, l_tile=None):
    B, L, C = q.shape
    c_head = C // num_heads
    if (l_tile is None or L % l_tile != 0
            or (l_tile % 8 != 0 and l_tile != L)):
        l_tile = _pick_l_tile(L)
    n_l = L // l_tile
    grid = (B, 2 * n_l)

    def qk_map(bi, si):   # stream during pass 1, park (no refetch) in pass 2
        return (bi, jnp.where(si < n_l, si, n_l - 1), 0)

    def v_map(bi, si):    # park during pass 1, stream during pass 2
        return (bi, jnp.where(si < n_l, 0, si - n_l), 0)

    blk = lambda m: pl.BlockSpec((1, l_tile, C), m)
    return pl.pallas_call(
        functools.partial(_attn_kernel, c_head=c_head),
        out_shape=jax.ShapeDtypeStruct((B, L, C), q.dtype),
        grid=grid,
        in_specs=[blk(qk_map), blk(qk_map), blk(v_map),
                  pl.BlockSpec((1, C), lambda bi, si: (0, 0))],   # temperature
        out_specs=blk(v_map),
        scratch_shapes=[pltpu.VMEM((C, C), jnp.float32),   # Gram accumulator
                        pltpu.VMEM((1, C), jnp.float32),   # sum q^2
                        pltpu.VMEM((1, C), jnp.float32),   # sum k^2
                        pltpu.VMEM((C, C), jnp.float32)],  # softmax matrix P
        compiler_params=pltpu.CompilerParams(
            dimension_semantics=("parallel", "arbitrary"),
            vmem_limit_bytes=_VMEM_LIMIT),
    )(q, k, v, t_row)


# ---------------------------------------------------------------------------
# Full forward pass (glue is reshapes only; layout converted once per boundary)
# ---------------------------------------------------------------------------
def attention_forward(x, params, num_heads, row_tile=1024, l_tile=None):
    B, C, H, W = x.shape
    N = B * H * W
    c_head = C // num_heads

    # NCHW -> NHWC once; everything below stays channels-last.
    x2d = jnp.transpose(x, (0, 2, 3, 1)).reshape(N, C)

    # qkv 1x1 conv: one row-tiled call, three outputs (q/k/v never merged, so no
    # jnp.split or channel slicing is needed downstream).
    wq, wk, wv = (params["w_qkv"][:, i * C:(i + 1) * C] for i in range(3))
    bq, bk, bv = (params["b_qkv"][i * C:(i + 1) * C].reshape(1, C) for i in range(3))
    q2d, k2d, v2d = pointwise_conv(x2d, [wq, wk, wv], [bq, bk, bv],
                                   row_tile=row_tile)

    # depthwise 3x3 conv, channels-last, halo handled in-kernel.
    def dw_params(i):
        w = params["w_dw"][i * C:(i + 1) * C]                        # (C, 3, 3)
        w9 = jnp.transpose(w.reshape(C, 9), (1, 0)).reshape(9, 1, 1, C)
        return w9, params["b_dw"][i * C:(i + 1) * C].reshape(1, 1, C)

    as_img = lambda t: t.reshape(B, H, W, C)
    q = dwconv3x3(as_img(q2d), *dw_params(0))
    k = dwconv3x3(as_img(k2d), *dw_params(1))
    v = dwconv3x3(as_img(v2d), *dw_params(2))

    # per-head channel attention (channels-last, L-streamed).
    t_row = jnp.repeat(params["temperature"].reshape(num_heads),
                       c_head).reshape(1, C)
    as_seq = lambda t: t.reshape(B, H * W, C)
    out = channel_attention(as_seq(q), as_seq(k), as_seq(v), t_row, num_heads,
                            l_tile=l_tile)

    # project_out 1x1 conv, then NHWC -> NCHW once.
    y2d = pointwise_conv(out.reshape(N, C), [params["w_proj"]],
                         [params["b_proj"].reshape(1, C)], row_tile=row_tile)[0]
    return jnp.transpose(y2d.reshape(B, H, W, C), (0, 3, 1, 2))


# ---------------------------------------------------------------------------
# Pure-JAX reference (f32, mirrors the PyTorch module) for correctness check
# ---------------------------------------------------------------------------
def reference_forward(x, params, num_heads):
    B, C, H, W = x.shape
    c_head = C // num_heads
    C3 = 3 * C

    qkv = jnp.einsum("bchw,cd->bdhw", x, params["w_qkv"]) \
        + params["b_qkv"].reshape(1, C3, 1, 1)
    qkv = jax.lax.conv_general_dilated(
        qkv, params["w_dw"].reshape(C3, 1, 3, 3),
        window_strides=(1, 1), padding=((1, 1), (1, 1)),
        dimension_numbers=("NCHW", "OIHW", "NCHW"), feature_group_count=C3)
    qkv = qkv + params["b_dw"].reshape(1, C3, 1, 1)

    q, k, v = jnp.split(qkv, 3, axis=1)
    sh = lambda t: t.reshape(B, num_heads, c_head, H * W)
    q, k, v = sh(q), sh(k), sh(v)
    nrm = lambda t: t / jnp.maximum(
        jnp.sqrt(jnp.sum(t * t, axis=-1, keepdims=True)), 1e-12)
    q, k = nrm(q), nrm(k)
    attn = jnp.einsum("bhcl,bhdl->bhcd", q, k) * params["temperature"][None]
    attn = jax.nn.softmax(attn, axis=-1)
    out = jnp.einsum("bhcd,bhdl->bhcl", attn, v).reshape(B, C, H, W)
    out = jnp.einsum("bchw,cd->bdhw", out, params["w_proj"]) \
        + params["b_proj"].reshape(1, C, 1, 1)
    return out


if __name__ == "__main__":
    B, C, H, W = 2, 16, 16, 16
    num_heads = 4
    C3 = 3 * C

    key = jax.random.PRNGKey(0)
    ks = jax.random.split(key, 8)
    s = 0.1
    params = {
        "w_qkv": jax.random.normal(ks[0], (C, C3), jnp.float32) * s,
        "b_qkv": jax.random.normal(ks[1], (C3,), jnp.float32) * s,
        "w_dw": jax.random.normal(ks[2], (C3, 3, 3), jnp.float32) * s,
        "b_dw": jax.random.normal(ks[3], (C3,), jnp.float32) * s,
        "w_proj": jax.random.normal(ks[4], (C, C), jnp.float32) * s,
        "b_proj": jax.random.normal(ks[5], (C,), jnp.float32) * s,
        "temperature": 1.0 + 0.1 * jax.random.normal(
            ks[6], (num_heads, 1, 1), jnp.float32),
    }
    x = jax.random.normal(ks[7], (B, C, H, W), jnp.float32)

    # small tiles to exercise the row-tiled and L-tiled (two-pass) code paths.
    out = attention_forward(x, params, num_heads, row_tile=128, l_tile=64)
    out = jax.block_until_ready(out)

    ref = jax.block_until_ready(reference_forward(x, params, num_heads))
    # bf16 MXU operands (intentional, per perf review) -> slightly loose tolerance.
    np.testing.assert_allclose(np.asarray(out), np.asarray(ref),
                               rtol=1e-2, atol=1e-2)
    print("KERNEL_OK")
</pallas_src>

<mosaic_0001>
module attributes {stable_mosaic.version = 11 : i64} {
  func.func @_pointwise_kernel(%arg0: i32, %arg1: memref<128x16xf32, #tpu.memory_space<vmem>>, %arg2: memref<16x16xf32, #tpu.memory_space<vmem>>, %arg3: memref<16x16xf32, #tpu.memory_space<vmem>>, %arg4: memref<16x16xf32, #tpu.memory_space<vmem>>, %arg5: memref<1x16xf32, #tpu.memory_space<vmem>>, %arg6: memref<1x16xf32, #tpu.memory_space<vmem>>, %arg7: memref<1x16xf32, #tpu.memory_space<vmem>>, %arg8: memref<128x16xf32, #tpu.memory_space<vmem>>, %arg9: memref<128x16xf32, #tpu.memory_space<vmem>>, %arg10: memref<128x16xf32, #tpu.memory_space<vmem>>) attributes {dimension_semantics = [#tpu.dimension_semantics<parallel>], iteration_bounds = array<i64: 4>, scalar_prefetch = 0 : i64, scratch_operands = 0 : i64, tpu.core_type = #tpu.core_type<tc>, window_params = [{transform_indices = @transform_0, window_bounds = array<i64: 128, 16>}, {pipeline_mode = #tpu.pipeline_mode<synchronous>, transform_indices = @transform_1, window_bounds = array<i64: 16, 16>}, {pipeline_mode = #tpu.pipeline_mode<synchronous>, transform_indices = @transform_2, window_bounds = array<i64: 16, 16>}, {pipeline_mode = #tpu.pipeline_mode<synchronous>, transform_indices = @transform_3, window_bounds = array<i64: 16, 16>}, {pipeline_mode = #tpu.pipeline_mode<synchronous>, transform_indices = @transform_4, window_bounds = array<i64: 1, 16>}, {pipeline_mode = #tpu.pipeline_mode<synchronous>, transform_indices = @transform_5, window_bounds = array<i64: 1, 16>}, {pipeline_mode = #tpu.pipeline_mode<synchronous>, transform_indices = @transform_6, window_bounds = array<i64: 1, 16>}, {transform_indices = @transform_7, window_bounds = array<i64: 128, 16>}, {transform_indices = @transform_8, window_bounds = array<i64: 128, 16>}, {transform_indices = @transform_9, window_bounds = array<i64: 128, 16>}]} {
    %c0 = arith.constant 0 : index
    %c0_0 = arith.constant 0 : index
    %0 = vector.load %arg1[%c0, %c0_0] : memref<128x16xf32, #tpu.memory_space<vmem>>, vector<128x16xf32>
    %1 = arith.truncf %0 : vector<128x16xf32> to vector<128x16xbf16>
    %c0_1 = arith.constant 0 : index
    %c0_2 = arith.constant 0 : index
    %2 = vector.load %arg2[%c0_1, %c0_2] : memref<16x16xf32, #tpu.memory_space<vmem>>, vector<16x16xf32>
    %3 = arith.truncf %2 : vector<16x16xf32> to vector<16x16xbf16>
    %cst = arith.constant dense<0.000000e+00> : vector<128x16xf32>
    %4 = tpu.matmul %1, %3, %cst {dimension_numbers = #tpu.dot_dimension_numbers<[1], [0], [0], [1], [0, 0, 1, 1], [], []>} : vector<128x16xbf16>, vector<16x16xbf16>, vector<128x16xf32> -> vector<128x16xf32>
    %c0_3 = arith.constant 0 : index
    %c0_4 = arith.constant 0 : index
    %5 = vector.load %arg5[%c0_3, %c0_4] : memref<1x16xf32, #tpu.memory_space<vmem>>, vector<1x16xf32>
    %6 = vector.broadcast %5 : vector<1x16xf32> to vector<128x16xf32>
    %7 = arith.addf %4, %6 : vector<128x16xf32>
    %c0_5 = arith.constant 0 : index
    %c0_6 = arith.constant 0 : index
    %8 = vector.load %arg8[%c0_5, %c0_6] : memref<128x16xf32, #tpu.memory_space<vmem>>, vector<128x16xf32>
    tpu.vector_store %arg8[%c0_5, %c0_6], %7 {strides = array<i32>} : memref<128x16xf32, #tpu.memory_space<vmem>>, vector<128x16xf32>,
    %c0_7 = arith.constant 0 : index
    %c0_8 = arith.constant 0 : index
    %9 = vector.load %arg3[%c0_7, %c0_8] : memref<16x16xf32, #tpu.memory_space<vmem>>, vector<16x16xf32>
    %10 = arith.truncf %9 : vector<16x16xf32> to vector<16x16xbf16>
    %cst_9 = arith.constant dense<0.000000e+00> : vector<128x16xf32>
    %11 = tpu.matmul %1, %10, %cst_9 {dimension_numbers = #tpu.dot_dimension_numbers<[1], [0], [0], [1], [0, 0, 1, 1], [], []>} : vector<128x16xbf16>, vector<16x16xbf16>, vector<128x16xf32> -> vector<128x16xf32>
    %c0_10 = arith.constant 0 : index
    %c0_11 = arith.constant 0 : index
    %12 = vector.load %arg6[%c0_10, %c0_11] : memref<1x16xf32, #tpu.memory_space<vmem>>, vector<1x16xf32>
    %13 = vector.broadcast %12 : vector<1x16xf32> to vector<128x16xf32>
    %14 = arith.addf %11, %13 : vector<128x16xf32>
    %c0_12 = arith.constant 0 : index
    %c0_13 = arith.constant 0 : index
    %15 = vector.load %arg9[%c0_12, %c0_13] : memref<128x16xf32, #tpu.memory_space<vmem>>, vector<128x16xf32>
    tpu.vector_store %arg9[%c0_12, %c0_13], %14 {strides = array<i32>} : memref<128x16xf32, #tpu.memory_space<vmem>>, vector<128x16xf32>,
    %c0_14 = arith.constant 0 : index
    %c0_15 = arith.constant 0 : index
    %16 = vector.load %arg4[%c0_14, %c0_15] : memref<16x16xf32, #tpu.memory_space<vmem>>, vector<16x16xf32>
    %17 = arith.truncf %16 : vector<16x16xf32> to vector<16x16xbf16>
    %cst_16 = arith.constant dense<0.000000e+00> : vector<128x16xf32>
    %18 = tpu.matmul %1, %17, %cst_16 {dimension_numbers = #tpu.dot_dimension_numbers<[1], [0], [0], [1], [0, 0, 1, 1], [], []>} : vector<128x16xbf16>, vector<16x16xbf16>, vector<128x16xf32> -> vector<128x16xf32>
    %c0_17 = arith.constant 0 : index
    %c0_18 = arith.constant 0 : index
    %19 = vector.load %arg7[%c0_17, %c0_18] : memref<1x16xf32, #tpu.memory_space<vmem>>, vector<1x16xf32>
    %20 = vector.broadcast %19 : vector<1x16xf32> to vector<128x16xf32>
    %21 = arith.addf %18, %20 : vector<128x16xf32>
    %c0_19 = arith.constant 0 : index
    %c0_20 = arith.constant 0 : index
    %22 = vector.load %arg10[%c0_19, %c0_20] : memref<128x16xf32, #tpu.memory_space<vmem>>, vector<128x16xf32>
    tpu.vector_store %arg10[%c0_19, %c0_20], %21 {strides = array<i32>} : memref<128x16xf32, #tpu.memory_space<vmem>>, vector<128x16xf32>,
    return
  }
  func.func @transform_0(%arg0: i32) -> (i32, i32) {
    %c0_i32 = arith.constant 0 : i32
    %c0_i32_0 = arith.constant 0 : i32
    return %arg0, %c0_i32 : i32, i32
  }
  func.func @transform_1(%arg0: i32) -> (i32, i32) {
    %c0_i32 = arith.constant 0 : i32
    %c0_i32_0 = arith.constant 0 : i32
    %c0_i32_1 = arith.constant 0 : i32
    return %c0_i32, %c0_i32_0 : i32, i32
  }
  func.func @transform_2(%arg0: i32) -> (i32, i32) {
    %c0_i32 = arith.constant 0 : i32
    %c0_i32_0 = arith.constant 0 : i32
    %c0_i32_1 = arith.constant 0 : i32
    return %c0_i32, %c0_i32_0 : i32, i32
  }
  func.func @transform_3(%arg0: i32) -> (i32, i32) {
    %c0_i32 = arith.constant 0 : i32
    %c0_i32_0 = arith.constant 0 : i32
    %c0_i32_1 = arith.constant 0 : i32
    return %c0_i32, %c0_i32_0 : i32, i32
  }
  func.func @transform_4(%arg0: i32) -> (i32, i32) {
    %c0_i32 = arith.constant 0 : i32
    %c0_i32_0 = arith.constant 0 : i32
    %c0_i32_1 = arith.constant 0 : i32
    return %c0_i32, %c0_i32_0 : i32, i32
  }
  func.func @transform_5(%arg0: i32) -> (i32, i32) {
    %c0_i32 = arith.constant 0 : i32
    %c0_i32_0 = arith.constant 0 : i32
    %c0_i32_1 = arith.constant 0 : i32
    return %c0_i32, %c0_i32_0 : i32, i32
  }
  func.func @transform_6(%arg0: i32) -> (i32, i32) {
    %c0_i32 = arith.constant 0 : i32
    %c0_i32_0 = arith.constant 0 : i32
    %c0_i32_1 = arith.constant 0 : i32
    return %c0_i32, %c0_i32_0 : i32, i32
  }
  func.func @transform_7(%arg0: i32) -> (i32, i32) {
    %c0_i32 = arith.constant 0 : i32
    %c0_i32_0 = arith.constant 0 : i32
    return %arg0, %c0_i32 : i32, i32
  }
  func.func @transform_8(%arg0: i32) -> (i32, i32) {
    %c0_i32 = arith.constant 0 : i32
    %c0_i32_0 = arith.constant 0 : i32
    return %arg0, %c0_i32 : i32, i32
  }
  func.func @transform_9(%arg0: i32) -> (i32, i32) {
    %c0_i32 = arith.constant 0 : i32
    %c0_i32_0 = arith.constant 0 : i32
    return %arg0, %c0_i32 : i32, i32
  }
}

</mosaic_0001>

<bundles_post_ra>
// kernel: tpu_custom_call.1
= control target key start
LH: loop header
LB: loop body
LE: loop exit
PB: predicated region body
PF: predicated region fallthrough
CT: control target
= control target key end

     0   :  { %s1097_s30 = smov 0   ;;  %s1315_s0 = inlined_call_operand.vmem [shape: f32[512,16], index: 0, kind: input, shape index: {}]   ;;  %s1316_s1 = inlined_call_operand.vmem [shape: f32[16,16], index: 1, kind: input, shape index: {}]   ;;  %s1317_s2 = inlined_call_operand.vmem [shape: f32[16,16], index: 2, kind: input, shape index: {}]   ;;  %s1318_s3 = inlined_call_operand.vmem [shape: f32[16,16], index: 3, kind: input, shape index: {}]   ;;  %s1319_s4 = inlined_call_operand.vmem [shape: f32[1,16], index: 4, kind: input, shape index: {}]   ;;  %s1320_s5 = inlined_call_operand.vmem [shape: f32[1,16], index: 5, kind: input, shape index: {}]   ;;  %s1321_s6 = inlined_call_operand.vmem [shape: f32[1,16], index: 6, kind: input, shape index: {}]   ;;  %s1322_s7 = inlined_call_operand.vmem [shape: f32[512,16], index: 7, kind: output, shape index: {0}]   ;;  %s1323_s8 = inlined_call_operand.vmem [shape: f32[512,16], index: 8, kind: output, shape index: {1}]   ;;  %s1324_s9 = inlined_call_operand.vmem [shape: f32[512,16], index: 9, kind: output, shape index: {2}]  }
   0x1 LB: > { %s906_s10 = sadd.s32 4294967295, %s1045_s30   ;;  %p910_p0 = scmp.ge.s32.totalorder %s1045_s30, 1  ;;  %s1045_s30 = sphi %s1097_s30, %s20_s30  }
   0x2   : > { %p293_p1 = scmp.lt.s32.totalorder %s1045_s30, 5 }
   0x4   : > { %p294_p2 = pnand %p910_p0, %p293_p1 }
   0x5   : > { %v388_v0 = vld [vmem:[%s1316_s1] sm:$0xff] (!%p294_p2)  ;;  %v389_v1 = vld [vmem:[%s1316_s1 + $0x8] sm:$0xff] (!%p294_p2)  ;;  %s911_s15 = sshll.u32 (!%p294_p2), %s906_s10, 4  ;;  %vm398_vm0 = vcmask (!%p294_p2), 130048  }
   0x6   : > { %297 = sbr.rel (%p294_p2) target bundleno = 279 (0x117), region = 48  ;;  %v536_v2 = vld [vmem:[%s1317_s2] sm:$0xff] (!%p294_p2)  ;;  %v390_v3 = vpack.c.bf16 (!%p294_p2), %v389_v1, %v388_v0  ;;  %p340_p3 = scmp.lt.s32.totalorder (!%p294_p2), %s911_s15, 63  ;;  %v537_v4 = vld [vmem:[%s1317_s2 + $0x8] sm:$0xff] (!%p294_p2) }
   0x7   : > { %v659_v5 = vld [vmem:[%s1318_s3] sm:$0xff] (!%p294_p2)  ;;  %v660_v6 = vld [vmem:[%s1318_s3 + $0x8] sm:$0xff] (!%p294_p2)  ;;  %v538_v7 = vpack.c.bf16 (!%p294_p2), %v537_v4, %v536_v2 }
   0x8   : > { %v661_v8 = vpack.c.bf16 (!%p294_p2), %v660_v6, %v659_v5  ;;  %975 = vmatprep.subr.bf16.mxu0 (!%p294_p2), %v390_v3  ;;  %1029 = vmatprep.subr.bf16.mxu1 (!%p294_p2), %v390_v3  ;;  %v919_v33 = vld [vmem:[%s1319_s4] ss:$0 sm:$0xff] (!%p294_p2) }
   0x9   : > { %976 = vmatpush3.bf16.msra.mxu0 (!%p294_p2), %v390_v3  ;;  %1030 = vmatpush3.bf16.msra.mxu1 (!%p294_p2), %v390_v3  ;;  %v1195_v2 = vld [vmem:[%s1321_s6] ss:$0 sm:$0xff] (!%p294_p2) }
   0xa   : > { %993 = vmatprep.subr.bf16.mxu1 (!%p294_p2), %v538_v7  ;;  %1011 = vmatprep.subr.bf16.mxu0 (!%p294_p2), %v661_v8  ;;  %v1202_v3 = vld [vmem:[%s1320_s5] ss:$0 sm:$0xff] (!%p294_p2) }
   0xd   : > { %s1326_s15 = smov (!%p340_p3, %s911_s15), 63 }
   0xe   : > { %s1123_s24 = sshll.u32 %s1326_s15, 3 }
   0xf   : > { %s343_s27 = scalar_lea.vmem %s1315_s0, %s1123_s24  ;;  %s1160_s12 = scalar_lea.vmem %s1322_s7, %s1123_s24 }
  0x10   : > { %v364_v9 = vld [vmem:[%s343_s27] sm:$0xff]  ;;  %v365_v10 = vld [vmem:[%s343_s27 + $0x8] sm:$0xff]  ;;  %v366_v14 = vld [vmem:[%s343_s27 + $0x10] sm:$0xff]  ;;  %s1208_s19 = scalar_lea.vmem %s1324_s9, %s1123_s24  ;;  %s1214_s22 = scalar_lea.vmem %s1323_s8, %s1123_s24 }
  0x11   : > { %v372_v11 = vld [vmem:[%s343_s27 + $0x40] sm:$0xff]  ;;  %v380_v12 = vpack.c.bf16 %v365_v10, %v364_v9  ;;  %v373_v13 = vld [vmem:[%s343_s27 + $0x48] sm:$0xff]  ;;  %v367_v15 = vld [vmem:[%s343_s27 + $0x18] sm:$0xff] }
  0x12   : > { %v384_v16 = vpack.c.bf16 %v373_v13, %v372_v11  ;;  %v381_v17 = vpack.c.bf16 %v367_v15, %v366_v14  ;;  %v374_v18 = vld [vmem:[%s343_s27 + $0x50] sm:$0xff]  ;;  %v375_v19 = vld [vmem:[%s343_s27 + $0x58] sm:$0xff]  ;;  %v368_v20 = vld [vmem:[%s343_s27 + $0x20] sm:$0xff] }
  0x13   : > { %977 = vmatprep.mubr.msk.bf16.mxu0 %vm398_vm0, %v380_v12  ;;  %v385_v21 = vpack.c.bf16 %v375_v19, %v374_v18  ;;  %v369_v22 = vld [vmem:[%s343_s27 + $0x28] sm:$0xff]  ;;  %v376_v23 = vld [vmem:[%s343_s27 + $0x60] sm:$0xff]  ;;  %v370_v27 = vld [vmem:[%s343_s27 + $0x30] sm:$0xff] }
  0x14   : > { %v377_v24 = vld [vmem:[%s343_s27 + $0x68] sm:$0xff]  ;;  %985 = vmatprep.mubr.msk.bf16.mxu1 %vm398_vm0, %v384_v16  ;;  %978 = vmatmul.mubr.msk.bf16.vlgmr.msra.gmra.mrb[0].mxu0 %vm398_vm0, %v381_v17  ;;  %v382_v25 = vpack.c.bf16 %v369_v22, %v368_v20  ;;  %v371_v28 = vld [vmem:[%s343_s27 + $0x38] sm:$0xff]  ;;  %v378_v29 = vld [vmem:[%s343_s27 + $0x70] sm:$0xff] }
  0x15   : > { %v386_v26 = vpack.c.bf16 %v377_v24, %v376_v23  ;;  %986 = vmatmul.mubr.msk.bf16.vlgmr.msra.gmra.mrb[0].mxu1 %vm398_vm0, %v385_v21  ;;  %1012 = vmatpush3.bf16.msra.mxu0 %v661_v8  ;;  %v379_v30 = vld [vmem:[%s343_s27 + $0x78] sm:$0xff]  ;;  %v383_v31 = vpack.c.bf16 %v371_v28, %v370_v27 }
  0x16   : > { %994 = vmatpush3.bf16.msra.mxu1 %v538_v7  ;;  %981 = vmatprep.mubr.msk.bf16.mxu0 %vm398_vm0, %v382_v25  ;;  %v387_v32 = vpack.c.bf16 %v379_v30, %v378_v29 }
  0x17   : > { %989 = vmatprep.mubr.msk.bf16.mxu1 %vm398_vm0, %v386_v26 }
  0x1c   : > { %982 = vmatmul.mubr.msk.bf16.gmra.mrb[4].mxu0 %vm398_vm0, %v383_v31 }
  0x1d   : > { %990 = vmatmul.mubr.msk.bf16.gmra.mrb[4].mxu1 %vm398_vm0, %v387_v32  ;;  %1013 = vmatprep.mubr.msk.bf16.mxu0 %vm398_vm0, %v380_v12 }
  0x1e   : > { %995 = vmatprep.mubr.msk.bf16.mxu1 %vm398_vm0, %v380_v12 }
  0x24   : > { %1014 = vmatmul.mubr.msk.bf16.vlgmr.msra.gmra.mrb[8].mxu0 %vm398_vm0, %v381_v17 }
  0x25   : > { %996 = vmatmul.mubr.msk.bf16.vlgmr.msra.gmra.mrb[8].mxu1 %vm398_vm0, %v381_v17  ;;  %1017 = vmatprep.mubr.msk.bf16.mxu0 %vm398_vm0, %v382_v25 }
  0x26   : > { %999 = vmatprep.mubr.msk.bf16.mxu1 %vm398_vm0, %v382_v25 }
  0x2c   : > { %1018 = vmatmul.mubr.msk.bf16.gmra.mrb[12].mxu0 %vm398_vm0, %v383_v31 }
  0x2d   : > { %1000 = vmatmul.mubr.msk.bf16.gmra.mrb[12].mxu1 %vm398_vm0, %v383_v31  ;;  %1021 = vmatprep.mubr.msk.bf16.mxu0 %vm398_vm0, %v384_v16 }
  0x2e   : > { %1003 = vmatprep.mubr.msk.bf16.mxu1 %vm398_vm0, %v384_v16 }
  0x34   : > { %1022 = vmatmul.mubr.msk.bf16.gmra.mrb[16].mxu0 %vm398_vm0, %v385_v21 }
  0x35   : > { %1004 = vmatmul.mubr.msk.bf16.gmra.mrb[16].mxu1 %vm398_vm0, %v385_v21  ;;  %1025 = vmatprep.mubr.msk.bf16.mxu0 %vm398_vm0, %v386_v26 }
  0x36   : > { %1007 = vmatprep.mubr.msk.bf16.mxu1 %vm398_vm0, %v386_v26 }
  0x3c   : > { %1026 = vmatmul.mubr.msk.bf16.gmra.mrb[20].mxu0 %vm398_vm0, %v387_v32 }
  0x3d   : > { %1008 = vmatmul.mubr.msk.bf16.gmra.mrb[20].mxu1 %vm398_vm0, %v387_v32 }
  0xe7   : > { %v979_v34 = vpop.f32.mrb[0].mxu0 }
  0xe8   : > { %v466_v35 = vadd.f32 %v979_v34, %v919_v33  ;;  %v987_v36 = vpop.f32.mrb[0].mxu1  ;;  %v457_v37 = vpop.f32.mrb[1].mxu0 }
  0xe9   : > { %v498_v38 = vadd.f32 %v987_v36, %v919_v33  ;;  %v458_v39 = vadd.f32 %v919_v33, %v457_v37  ;;  %v489_v40 = vpop.f32.mrb[1].mxu1  ;;  %v980_v41 = vpop.f32.mrb[2].mxu0 }
  0xea   : > { %522 = vst.msk [vmem:[%s1160_s12 + $0x10] sm:$0xff] %vm398_vm0, %v466_v35  ;;  %v490_v42 = vadd.f32 %v919_v33, %v489_v40  ;;  %v469_v43 = vadd.f32 %v980_v41, %v919_v33  ;;  %v988_v44 = vpop.f32.mrb[2].mxu1  ;;  %v460_v45 = vpop.f32.mrb[3].mxu0 }
  0xeb   : > { %530 = vst.msk [vmem:[%s1160_s12 + $0x50] sm:$0xff] %vm398_vm0, %v498_v38  ;;  %520 = vst.msk [vmem:[%s1160_s12] sm:$0xff] %vm398_vm0, %v458_v39  ;;  %v501_v46 = vadd.f32 %v988_v44, %v919_v33  ;;  %v461_v47 = vadd.f32 %v919_v33, %v460_v45  ;;  %v492_v48 = vpop.f32.mrb[3].mxu1 }
  0xec   : > { %528 = vst.msk [vmem:[%s1160_s12 + $0x40] sm:$0xff] %vm398_vm0, %v490_v42  ;;  %523 = vst.msk [vmem:[%s1160_s12 + $0x18] sm:$0xff] %vm398_vm0, %v469_v43  ;;  %v493_v49 = vadd.f32 %v919_v33, %v492_v48 }
  0xed   : > { %531 = vst.msk [vmem:[%s1160_s12 + $0x58] sm:$0xff] %vm398_vm0, %v501_v46  ;;  %521 = vst.msk [vmem:[%s1160_s12 + $0x8] sm:$0xff] %vm398_vm0, %v461_v47 }
  0xee   : > { %529 = vst.msk [vmem:[%s1160_s12 + $0x48] sm:$0xff] %vm398_vm0, %v493_v49 }
  0xef   : > { %v983_v50 = vpop.f32.mrb[4].mxu0 }
  0xf0   : > { %v482_v51 = vadd.f32 %v983_v50, %v919_v33  ;;  %v991_v52 = vpop.f32.mrb[4].mxu1  ;;  %v473_v53 = vpop.f32.mrb[5].mxu0 }
  0xf1   : > { %v514_v54 = vadd.f32 %v991_v52, %v919_v33  ;;  %v474_v55 = vadd.f32 %v919_v33, %v473_v53  ;;  %v505_v56 = vpop.f32.mrb[5].mxu1  ;;  %v984_v57 = vpop.f32.mrb[6].mxu0 }
  0xf2   : > { %526 = vst.msk [vmem:[%s1160_s12 + $0x30] sm:$0xff] %vm398_vm0, %v482_v51  ;;  %v506_v58 = vadd.f32 %v919_v33, %v505_v56  ;;  %v485_v59 = vadd.f32 %v984_v57, %v919_v33  ;;  %v992_v60 = vpop.f32.mrb[6].mxu1  ;;  %v476_v61 = vpop.f32.mrb[7].mxu0 }
  0xf3   : > { %534 = vst.msk [vmem:[%s1160_s12 + $0x70] sm:$0xff] %vm398_vm0, %v514_v54  ;;  %524 = vst.msk [vmem:[%s1160_s12 + $0x20] sm:$0xff] %vm398_vm0, %v474_v55  ;;  %v517_v62 = vadd.f32 %v992_v60, %v919_v33  ;;  %v477_v63 = vadd.f32 %v919_v33, %v476_v61  ;;  %v508_v0 = vpop.f32.mrb[7].mxu1 }
  0xf4   : > { %532 = vst.msk [vmem:[%s1160_s12 + $0x60] sm:$0xff] %vm398_vm0, %v506_v58  ;;  %527 = vst.msk [vmem:[%s1160_s12 + $0x38] sm:$0xff] %vm398_vm0, %v485_v59  ;;  %v509_v1 = vadd.f32 %v919_v33, %v508_v0 }
  0xf5   : > { %535 = vst.msk [vmem:[%s1160_s12 + $0x78] sm:$0xff] %vm398_vm0, %v517_v62  ;;  %525 = vst.msk [vmem:[%s1160_s12 + $0x28] sm:$0xff] %vm398_vm0, %v477_v63 }
  0xf6   : > { %533 = vst.msk [vmem:[%s1160_s12 + $0x68] sm:$0xff] %vm398_vm0, %v509_v1 }
  0xf7   : > { %v1015_v4 = vpop.f32.mrb[8].mxu0 }
  0xf8   : > { %v997_v5 = vpop.f32.mrb[8].mxu1  ;;  %v712_v6 = vadd.f32 %v1015_v4, %v1195_v2  ;;  %v703_v7 = vpop.f32.mrb[9].mxu0 }
  0xf9   : > { %v589_v8 = vadd.f32 %v997_v5, %v1202_v3  ;;  %v580_v9 = vpop.f32.mrb[9].mxu1  ;;  %v704_v10 = vadd.f32 %v1195_v2, %v703_v7  ;;  %v1016_v11 = vpop.f32.mrb[10].mxu0 }
  0xfa   : > { %768 = vst.msk [vmem:[%s1208_s19 + $0x10] sm:$0xff] %vm398_vm0, %v712_v6  ;;  %v581_v12 = vadd.f32 %v1202_v3, %v580_v9  ;;  %v998_v13 = vpop.f32.mrb[10].mxu1  ;;  %v715_v14 = vadd.f32 %v1016_v11, %v1195_v2  ;;  %v706_v15 = vpop.f32.mrb[11].mxu0 }
  0xfb   : > { %645 = vst.msk [vmem:[%s1214_s22 + $0x10] sm:$0xff] %vm398_vm0, %v589_v8  ;;  %766 = vst.msk [vmem:[%s1208_s19] sm:$0xff] %vm398_vm0, %v704_v10  ;;  %v592_v16 = vadd.f32 %v998_v13, %v1202_v3  ;;  %v583_v17 = vpop.f32.mrb[11].mxu1  ;;  %v707_v18 = vadd.f32 %v1195_v2, %v706_v15 }
  0xfc   : > { %643 = vst.msk [vmem:[%s1214_s22] sm:$0xff] %vm398_vm0, %v581_v12  ;;  %769 = vst.msk [vmem:[%s1208_s19 + $0x18] sm:$0xff] %vm398_vm0, %v715_v14  ;;  %v584_v19 = vadd.f32 %v1202_v3, %v583_v17 }
  0xfd   : > { %646 = vst.msk [vmem:[%s1214_s22 + $0x18] sm:$0xff] %vm398_vm0, %v592_v16  ;;  %767 = vst.msk [vmem:[%s1208_s19 + $0x8] sm:$0xff] %vm398_vm0, %v707_v18 }
  0xfe   : > { %644 = vst.msk [vmem:[%s1214_s22 + $0x8] sm:$0xff] %vm398_vm0, %v584_v19 }
  0xff   : > { %v1019_v20 = vpop.f32.mrb[12].mxu0 }
 0x100   : > { %v1001_v21 = vpop.f32.mrb[12].mxu1  ;;  %v728_v22 = vadd.f32 %v1019_v20, %v1195_v2  ;;  %v719_v23 = vpop.f32.mrb[13].mxu0 }
 0x101   : > { %v605_v24 = vadd.f32 %v1001_v21, %v1202_v3  ;;  %v596_v25 = vpop.f32.mrb[13].mxu1  ;;  %v720_v26 = vadd.f32 %v1195_v2, %v719_v23  ;;  %v1020_v27 = vpop.f32.mrb[14].mxu0 }
 0x102   : > { %772 = vst.msk [vmem:[%s1208_s19 + $0x30] sm:$0xff] %vm398_vm0, %v728_v22  ;;  %v597_v28 = vadd.f32 %v1202_v3, %v596_v25  ;;  %v1002_v29 = vpop.f32.mrb[14].mxu1  ;;  %v731_v30 = vadd.f32 %v1020_v27, %v1195_v2  ;;  %v722_v31 = vpop.f32.mrb[15].mxu0 }
 0x103   : > { %649 = vst.msk [vmem:[%s1214_s22 + $0x30] sm:$0xff] %vm398_vm0, %v605_v24  ;;  %770 = vst.msk [vmem:[%s1208_s19 + $0x20] sm:$0xff] %vm398_vm0, %v720_v26  ;;  %v608_v32 = vadd.f32 %v1002_v29, %v1202_v3  ;;  %v599_v33 = vpop.f32.mrb[15].mxu1  ;;  %v723_v34 = vadd.f32 %v1195_v2, %v722_v31 }
 0x104   : > { %647 = vst.msk [vmem:[%s1214_s22 + $0x20] sm:$0xff] %vm398_vm0, %v597_v28  ;;  %773 = vst.msk [vmem:[%s1208_s19 + $0x38] sm:$0xff] %vm398_vm0, %v731_v30  ;;  %v600_v35 = vadd.f32 %v1202_v3, %v599_v33 }
 0x105   : > { %650 = vst.msk [vmem:[%s1214_s22 + $0x38] sm:$0xff] %vm398_vm0, %v608_v32  ;;  %771 = vst.msk [vmem:[%s1208_s19 + $0x28] sm:$0xff] %vm398_vm0, %v723_v34 }
 0x106   : > { %648 = vst.msk [vmem:[%s1214_s22 + $0x28] sm:$0xff] %vm398_vm0, %v600_v35 }
 0x107   : > { %v1023_v36 = vpop.f32.mrb[16].mxu0 }
 0x108   : > { %v1005_v37 = vpop.f32.mrb[16].mxu1  ;;  %v744_v38 = vadd.f32 %v1023_v36, %v1195_v2  ;;  %v735_v39 = vpop.f32.mrb[17].mxu0 }
 0x109   : > { %v621_v40 = vadd.f32 %v1005_v37, %v1202_v3  ;;  %v612_v41 = vpop.f32.mrb[17].mxu1  ;;  %v736_v42 = vadd.f32 %v1195_v2, %v735_v39  ;;  %v1024_v43 = vpop.f32.mrb[18].mxu0 }
 0x10a   : > { %776 = vst.msk [vmem:[%s1208_s19 + $0x50] sm:$0xff] %vm398_vm0, %v744_v38  ;;  %v613_v44 = vadd.f32 %v1202_v3, %v612_v41  ;;  %v1006_v45 = vpop.f32.mrb[18].mxu1  ;;  %v747_v46 = vadd.f32 %v1024_v43, %v1195_v2  ;;  %v738_v47 = vpop.f32.mrb[19].mxu0 }
 0x10b   : > { %653 = vst.msk [vmem:[%s1214_s22 + $0x50] sm:$0xff] %vm398_vm0, %v621_v40  ;;  %774 = vst.msk [vmem:[%s1208_s19 + $0x40] sm:$0xff] %vm398_vm0, %v736_v42  ;;  %v624_v48 = vadd.f32 %v1006_v45, %v1202_v3  ;;  %v615_v49 = vpop.f32.mrb[19].mxu1  ;;  %v739_v50 = vadd.f32 %v1195_v2, %v738_v47 }
 0x10c   : > { %651 = vst.msk [vmem:[%s1214_s22 + $0x40] sm:$0xff] %vm398_vm0, %v613_v44  ;;  %777 = vst.msk [vmem:[%s1208_s19 + $0x58] sm:$0xff] %vm398_vm0, %v747_v46  ;;  %v616_v51 = vadd.f32 %v1202_v3, %v615_v49 }
 0x10d   : > { %654 = vst.msk [vmem:[%s1214_s22 + $0x58] sm:$0xff] %vm398_vm0, %v624_v48  ;;  %775 = vst.msk [vmem:[%s1208_s19 + $0x48] sm:$0xff] %vm398_vm0, %v739_v50 }
 0x10e   : > { %652 = vst.msk [vmem:[%s1214_s22 + $0x48] sm:$0xff] %vm398_vm0, %v616_v51 }
 0x10f   : > { %v1027_v52 = vpop.f32.mrb[20].mxu0 }
 0x110   : > { %v1009_v53 = vpop.f32.mrb[20].mxu1  ;;  %v760_v54 = vadd.f32 %v1027_v52, %v1195_v2  ;;  %v751_v55 = vpop.f32.mrb[21].mxu0 }
 0x111   : > { %v637_v56 = vadd.f32 %v1009_v53, %v1202_v3  ;;  %v628_v57 = vpop.f32.mrb[21].mxu1  ;;  %v752_v58 = vadd.f32 %v1195_v2, %v751_v55  ;;  %v1028_v59 = vpop.f32.mrb[22].mxu0 }
 0x112   : > { %780 = vst.msk [vmem:[%s1208_s19 + $0x70] sm:$0xff] %vm398_vm0, %v760_v54  ;;  %v629_v60 = vadd.f32 %v1202_v3, %v628_v57  ;;  %v1010_v61 = vpop.f32.mrb[22].mxu1  ;;  %v763_v62 = vadd.f32 %v1028_v59, %v1195_v2  ;;  %v754_v63 = vpop.f32.mrb[23].mxu0 }
 0x113   : > { %657 = vst.msk [vmem:[%s1214_s22 + $0x70] sm:$0xff] %vm398_vm0, %v637_v56  ;;  %778 = vst.msk [vmem:[%s1208_s19 + $0x60] sm:$0xff] %vm398_vm0, %v752_v58  ;;  %v640_v0 = vadd.f32 %v1010_v61, %v1202_v3  ;;  %v631_v1 = vpop.f32.mrb[23].mxu1  ;;  %v755_v4 = vadd.f32 %v1195_v2, %v754_v63 }
 0x114   : > { %655 = vst.msk [vmem:[%s1214_s22 + $0x60] sm:$0xff] %vm398_vm0, %v629_v60  ;;  %781 = vst.msk [vmem:[%s1208_s19 + $0x78] sm:$0xff] %vm398_vm0, %v763_v62  ;;  %v632_v5 = vadd.f32 %v1202_v3, %v631_v1 }
 0x115   : > { %658 = vst.msk [vmem:[%s1214_s22 + $0x78] sm:$0xff] %vm398_vm0, %v640_v0  ;;  %779 = vst.msk [vmem:[%s1208_s19 + $0x68] sm:$0xff] %vm398_vm0, %v755_v4 }
 0x116   : > { %656 = vst.msk [vmem:[%s1214_s22 + $0x68] sm:$0xff] %vm398_vm0, %v632_v5 }
 0x117 PF: > { %s20_s30 = sadd.s32 1, %s1045_s30  }
 0x118   : > { %p17_p4 = scmp.ge.s32.totalorder %s20_s30, 6  }
 0x11a   :  { %19 = sbr.rel (!%p17_p4) target bundleno = 1 (0x1), region = 102 }

</bundles_post_ra>
